<compile_context>
chip_gen: v5e
topology: v5e:2x2
jax: 0.10.0
libtpu: 0.0.40
codegen_flags: <defaults>
</compile_context>

<pallas_src>
import functools
import math

import jax
import jax.numpy as jnp
from jax.experimental import pallas as pl
from jax.experimental.pallas import tpu as pltpu


# ---------------------------------------------------------------------------
# Kernels
# ---------------------------------------------------------------------------
def _pe_add_kernel(x_ref, pe_ref, o_ref):
    # x_ref: (TS, B, D), pe_ref: (TS, D), o_ref: (TS, B, D)
    o_ref[...] = (x_ref[...] + pe_ref[...][:, None, :]).astype(o_ref.dtype)


def _mix32(x):
    """lowbias32 finalizer (Chris Wellons) -- cheap, well-avalanched 32-bit hash."""
    x = x ^ (x >> jnp.uint32(16))
    x = x * jnp.uint32(0x7FEB352D)
    x = x ^ (x >> jnp.uint32(15))
    x = x * jnp.uint32(0x846CA68B)
    x = x ^ (x >> jnp.uint32(16))
    return x


def _pe_add_dropout_kernel(seed_ref, x_ref, pe_ref, o_ref, *, p):
    # Training path: PE add followed by inverted dropout (drop prob p, scale 1/(1-p)).
    # Randomness = hash(global element counter, seed); portable (no TPU-only PRNG
    # primitives) and unique per tile because the counter includes the tile offset.
    y = x_ref[...] + pe_ref[...][:, None, :]
    ts, b, d = y.shape

    # Per-element flat index within the tile (int32 iota is universally supported).
    i0 = jax.lax.broadcasted_iota(jnp.int32, y.shape, 0)
    i1 = jax.lax.broadcasted_iota(jnp.int32, y.shape, 1)
    i2 = jax.lax.broadcasted_iota(jnp.int32, y.shape, 2)
    flat = (i0 * jnp.int32(b * d) + i1 * jnp.int32(d) + i2).astype(jnp.uint32)

    tile_off = pl.program_id(0).astype(jnp.uint32) * jnp.uint32(ts * b * d)
    key = _mix32(seed_ref[0].astype(jnp.uint32) ^ jnp.uint32(0x9E3779B9))
    bits = _mix32((flat + tile_off) ^ key)

    # keep iff uniform >= p   (bias <= 2^-32, negligible)
    thresh = jnp.uint32(min(int(p * (2.0 ** 32)), (1 << 32) - 1))
    keep = bits >= thresh

    # Keep the math in x's dtype (no f32 upcast -> half the vreg/VMEM footprint for bf16).
    scale = jnp.asarray(1.0 / (1.0 - p), dtype=y.dtype)
    o_ref[...] = jnp.where(keep, y * scale, jnp.zeros_like(y)).astype(o_ref.dtype)


# ---------------------------------------------------------------------------
# Parameter (buffer) setup — deterministic, mirrors torch __init__
# ---------------------------------------------------------------------------
def make_pe_table(max_len, d_model, dtype=jnp.float32):
    position = jnp.arange(max_len, dtype=jnp.float32)[:, None]                 # (max_len, 1)
    div_term = jnp.exp(
        jnp.arange(0, d_model, 2, dtype=jnp.float32) * (-math.log(10000.0) / d_model)
    )                                                                          # (d_model//2,)
    ang = position * div_term                                                  # (max_len, d_model//2)
    pe = jnp.zeros((max_len, d_model), dtype=jnp.float32)
    pe = pe.at[:, 0::2].set(jnp.sin(ang))
    pe = pe.at[:, 1::2].set(jnp.cos(ang))
    return pe.astype(dtype)


# ---------------------------------------------------------------------------
# Tiling helper
# ---------------------------------------------------------------------------
def _choose_block_seq(S, B, D, itemsize, target_bytes=2 << 20):
    """Largest multiple-of-8 seq tile whose x-block is <= ~target_bytes (big tiles
    amortize the ~0.35us per-grid-step overhead; a ~2 MiB x-tile keeps the
    double-buffered footprint well under the scoped VMEM limit on v5e/v6e/v7x)."""
    rows = max(8, target_bytes // max(1, B * D * itemsize))
    rows -= rows % 8
    return S if rows >= S else int(rows)


# ---------------------------------------------------------------------------
# Wrapper
# ---------------------------------------------------------------------------
def positional_encoding(x, pe_table, *, p=0.1, training=False, seed=0, block_seq=None):
    """Pallas equivalent of PositionalEncoding.forward; x: (seq_len, batch, d_model)."""
    S, B, D = x.shape
    pe = pe_table[:S].astype(x.dtype)          # (S, D) slice of the registered buffer

    if block_seq is None:
        TS = _choose_block_seq(S, B, D, jnp.dtype(x.dtype).itemsize)
    else:
        TS = min(int(block_seq), S)
        if TS != S and TS % 8 != 0:            # pe block needs sublane-aligned rows
            TS = max(8, TS - TS % 8)
    grid = (pl.cdiv(S, TS),)

    out_shape = jax.ShapeDtypeStruct((S, B, D), x.dtype)
    compiler_params = pltpu.CompilerParams(
        dimension_semantics=("parallel",),      # seq tiles are independent (2 TCs on v7x)
        vmem_limit_bytes=32 * 1024 * 1024,
    )

    if (not training) or p == 0.0:
        # Eval mode (or p == 0): dropout is the identity.
        x_spec = pl.BlockSpec((TS, B, D), lambda i: (i, 0, 0))
        pe_spec = pl.BlockSpec((TS, D), lambda i: (i, 0))
        return pl.pallas_call(
            _pe_add_kernel,
            out_shape=out_shape,
            grid_spec=pltpu.PrefetchScalarGridSpec(
                num_scalar_prefetch=0,
                grid=grid,
                in_specs=[x_spec, pe_spec],
                out_specs=x_spec,
            ),
            compiler_params=compiler_params,
        )(x, pe)

    if p >= 1.0:
        # Degenerate torch Dropout(p=1.0): everything dropped (avoids 1/(1-p) == inf).
        return jnp.zeros_like(x)

    seed_arr = jnp.asarray([seed], dtype=jnp.int32)
    kernel = functools.partial(_pe_add_dropout_kernel, p=float(p))
    return pl.pallas_call(
        kernel,
        out_shape=out_shape,
        grid_spec=pltpu.PrefetchScalarGridSpec(
            num_scalar_prefetch=1,              # seed lands in SMEM
            grid=grid,
            in_specs=[pl.BlockSpec((TS, B, D), lambda i, seed_ref: (i, 0, 0)),
                      pl.BlockSpec((TS, D), lambda i, seed_ref: (i, 0))],
            out_specs=pl.BlockSpec((TS, B, D), lambda i, seed_ref: (i, 0, 0)),
        ),
        compiler_params=compiler_params,
    )(seed_arr, x, pe)


# ---------------------------------------------------------------------------
# Main
# ---------------------------------------------------------------------------
if __name__ == "__main__":
    d_model = 128        # lane-dense last dim (multiple of 128 -> unmasked stores)
    max_len = 256
    seq_len = 128
    batch = 8            # fills the 8-wide sublane axis

    key = jax.random.PRNGKey(0)
    x = jax.random.normal(key, (seq_len, batch, d_model), dtype=jnp.float32)
    pe_table = make_pe_table(max_len, d_model)
    ref = x + pe_table[:seq_len][:, None, :]

    # Eval mode with an explicit small tile to exercise the multi-step grid (4 steps).
    out = jax.block_until_ready(
        positional_encoding(x, pe_table, p=0.1, training=False, block_seq=32))
    assert out.shape == (seq_len, batch, d_model)
    assert jnp.allclose(out, ref, atol=1e-6, rtol=1e-6), "eval-mode mismatch vs reference"

    # Eval mode with auto-sized tiles.
    out2 = jax.block_until_ready(positional_encoding(x, pe_table, training=False))
    assert jnp.allclose(out2, ref, atol=1e-6, rtol=1e-6), "auto-tile mismatch vs reference"

    # Training mode: inverted dropout via an in-kernel counter-based hash PRNG.
    # TODO(synk): dropout cannot bit-match torch's RNG stream; validated statistically
    # plus an exact check that kept elements equal ref / (1 - p).
    p = 0.25
    out_tr = jax.block_until_ready(
        positional_encoding(x, pe_table, p=p, training=True, seed=123, block_seq=32))
    keep_mask = out_tr != 0.0
    keep_frac = float(jnp.mean(keep_mask.astype(jnp.float32)))
    assert out_tr.shape == x.shape
    assert 0.65 < keep_frac < 0.85, f"keep fraction {keep_frac} far from {1.0 - p}"
    scaled_ref = ref / (1.0 - p)
    assert jnp.allclose(jnp.where(keep_mask, out_tr, 0.0),
                        jnp.where(keep_mask, scaled_ref, 0.0),
                        atol=1e-5, rtol=1e-5), "training-mode kept values mismatch"

    # Different seeds should give different dropout masks.
    out_tr2 = jax.block_until_ready(
        positional_encoding(x, pe_table, p=p, training=True, seed=7, block_seq=32))
    assert not jnp.array_equal(out_tr, out_tr2), "dropout masks identical across seeds"

    print("KERNEL_OK")
</pallas_src>

<mosaic_0001>
module attributes {stable_mosaic.version = 11 : i64} {
  func.func @_pe_add_kernel(%arg0: i32, %arg1: memref<32x8x128xf32, #tpu.memory_space<vmem>>, %arg2: memref<32x128xf32, #tpu.memory_space<vmem>>, %arg3: memref<32x8x128xf32, #tpu.memory_space<vmem>>) attributes {dimension_semantics = [#tpu.dimension_semantics<parallel>], iteration_bounds = array<i64: 4>, scalar_prefetch = 0 : i64, scratch_operands = 0 : i64, tpu.core_type = #tpu.core_type<tc>, window_params = [{transform_indices = @transform_0, window_bounds = array<i64: 32, 8, 128>}, {transform_indices = @transform_1, window_bounds = array<i64: 32, 128>}, {transform_indices = @transform_2, window_bounds = array<i64: 32, 8, 128>}]} {
    %c0 = arith.constant 0 : index
    %c0_0 = arith.constant 0 : index
    %c0_1 = arith.constant 0 : index
    %0 = vector.load %arg1[%c0, %c0_0, %c0_1] : memref<32x8x128xf32, #tpu.memory_space<vmem>>, vector<32x8x128xf32>
    %c0_2 = arith.constant 0 : index
    %c0_3 = arith.constant 0 : index
    %1 = vector.load %arg2[%c0_2, %c0_3] : memref<32x128xf32, #tpu.memory_space<vmem>>, vector<32x128xf32>
    %2 = vector.shape_cast %1 : vector<32x128xf32> to vector<32x1x128xf32>
    %3 = vector.broadcast %2 : vector<32x1x128xf32> to vector<32x8x128xf32>
    %4 = arith.addf %0, %3 : vector<32x8x128xf32>
    %c0_4 = arith.constant 0 : index
    %c0_5 = arith.constant 0 : index
    %c0_6 = arith.constant 0 : index
    %5 = vector.load %arg3[%c0_4, %c0_5, %c0_6] : memref<32x8x128xf32, #tpu.memory_space<vmem>>, vector<32x8x128xf32>
    tpu.vector_store %arg3[%c0_4, %c0_5, %c0_6], %4 {strides = array<i32>} : memref<32x8x128xf32, #tpu.memory_space<vmem>>, vector<32x8x128xf32>,
    return
  }
  func.func @transform_0(%arg0: i32) -> (i32, i32, i32) {
    %c0_i32 = arith.constant 0 : i32
    %c0_i32_0 = arith.constant 0 : i32
    %c0_i32_1 = arith.constant 0 : i32
    return %arg0, %c0_i32, %c0_i32_0 : i32, i32, i32
  }
  func.func @transform_1(%arg0: i32) -> (i32, i32) {
    %c0_i32 = arith.constant 0 : i32
    %c0_i32_0 = arith.constant 0 : i32
    return %arg0, %c0_i32 : i32, i32
  }
  func.func @transform_2(%arg0: i32) -> (i32, i32, i32) {
    %c0_i32 = arith.constant 0 : i32
    %c0_i32_0 = arith.constant 0 : i32
    %c0_i32_1 = arith.constant 0 : i32
    return %arg0, %c0_i32, %c0_i32_0 : i32, i32, i32
  }
}

</mosaic_0001>

<bundles_post_ra>
// kernel: tpu_custom_call.1
= control target key start
LH: loop header
LB: loop body
LE: loop exit
PB: predicated region body
PF: predicated region fallthrough
CT: control target
= control target key end

     0   :  { %s984_s0 = inlined_call_operand.hbm [shape: f32[128,8,128], index: 0, kind: input, shape index: {}]   ;;  %s985_s1 = inlined_call_operand.hbm [shape: f32[128,128], index: 1, kind: input, shape index: {}]   ;;  %s986_s2 = inlined_call_operand.hbm [shape: f32[128,8,128], index: 2, kind: output, shape index: {}]  }
   0x1   :  { %987 = sst [smem:[#allocation11_spill]] %s984_s0 }
   0x2   :  { %7 = vsyncpa [#allocation3], 0 }
   0x3   :  { %9 = vsyncpa [#allocation3 + $0x1], 0 }
   0x4   :  { %10 = vsyncpa [#allocation6], 0 }
   0x5   :  { %12 = vsyncpa [#allocation6 + $0x1], 0 }
   0x6   :  { %13 = vsyncpa [#allocation4], 0 }
   0x7   :  { %15 = vsyncpa [#allocation4 + $0x1], 0  ;;  %s744_s9 = smov 0   ;;  %s746_s10 = smov 0  }
   0x8   :  { %s748_s11 = smov 0   ;;  %s750_s12 = smov 0  }
   0x9 LB: > { %s765_s13 = sadd.s32 4294967295, %s723_s12   ;;  %s517_s14 = sadd.s32 4294967294, %s723_s12   ;;  %s723_s12 = sphi %s750_s12, %s998_s12   ;;  %s719_s11 = sphi %s748_s11, %s997_s11   ;;  %s715_s10 = sphi %s746_s10, %s996_s10   ;;  %s711_s9 = sphi %s744_s9, %s995_s9  }
   0xa   : > { %s769_s15 = sadd.s32 1, %s723_s12   ;;  %s28_s16 = sadd.s32 1, %s719_s11 }
   0xb   : > { %s25_s17 = ssub.s32 %s723_s12, %s769_s15  ;;  %p35_p0 = scmp.ne.s32.totalorder %s719_s11, %s715_s10 }
   0xc   : > { %p26_p1 = scmp.eq.s32.totalorder %s25_s17, 0  ;;  %p36_p2 = scmp.eq.s32.totalorder %s723_s12, 0 }
   0xd   : > { %p41_p3 = scmp.ne.s32.totalorder %s715_s10, %s711_s9  ;;  %p42_p4 = scmp.eq.s32.totalorder %s765_s13, 0 }
   0xe   : > { %s781_s18 = scalar_select %p26_p1, %s719_s11, %s28_s16  }
   0xf   : > { %p783_p5 = por %p36_p2, %p35_p0  ;;  %p787_p6 = por %p42_p4, %p41_p3 }
  0x10   : > { %p91_p7 = scmp.eq.s32.totalorder %s765_s13, 3  ;;  %p97_p8 = scmp.eq.s32.totalorder %s517_s14, 3 }
  0x11   : > { %p555_p9 = scmp.lt.s32.totalorder %s723_s12, 4  ;;  %s802_s23 = sand.u32 1, %s719_s11  }
  0x12   : > { %p793_p10 = por %p91_p7, %p35_p0  ;;  %p797_p11 = por %p97_p8, %p41_p3 }
  0x13   : > { %s535_s24 = sshll.u32 %s723_s12, 8  ;;  %s520_s25 = sshll.u32 %s802_s23, 8 }
  0x14   : > { %s992_s0 = sld [smem:[#allocation11_spill]]  ;;  %s121_s30 = scalar_lea.vmem [#allocation2], %s520_s25 }
  0x15   : > { %s129_s3 = sshll.u32 %s121_s30, 4  ;;  %p811_p12 = pnand %p555_p9, %p783_p5  ;;  %s130_s3 = int_to_ptr.vmem [resolvable:$true] %s129_s3 }
  0x16   : > { %p526_p13 = scmp.ge.s32.totalorder %s723_s12, 1  ;;  %p159_p0 = scmp.lt.s32.totalorder %s723_s12, 5 }
  0x17   : > { %s118_s5 = scalar_lea.sflag [#allocation3], %s802_s23  ;;  %p597_p2 = pneg %p811_p12 }
  0x1a   : > { %s126_s28 = scalar_lea.hbm %s992_s0, %s535_s24  ;;  %s600_s16 = scalar_lea.hbm %s992_s0, 1024 }
  0x1b   : > { %s127_s29 = sshll.u32 %s126_s28, 4  ;;  %s128_s29 = int_to_ptr.hbm [resolvable:$true] %s127_s29 }
  0x1c   : > { %s593_s6 = sshra.s32 %s128_s29, 4  ;;  %s594_s6 = int_to_ptr.hbm [resolvable:$true] %s593_s6 }
  0x1d   : > { %s595_s7 = scalar_lea.hbm %s594_s6, 256  ;;  %p601_p5 = scmp.lt.s32.totalorder %s594_s6, %s992_s0 }
  0x1e   : > { %p596_p1 = scmp.ne.s32.totalorder %s594_s6, %s595_s7  ;;  %p602_p7 = scmp.lt.s32.totalorder %s600_s16, %s595_s7 }
  0x20   : > { %p598_p3 = pnand %p597_p2, %p596_p1  ;;  %p603_p8 = por %p602_p7, %p601_p5 }
  0x22   : > { %p599_p4 = pneg %p598_p3 }
  0x24   : > { %p604_p9 = pnand %p603_p8, %p599_p4 }
  0x26   : > { %607 = shalt.err (!%p604_p9)
}
  0x27   : > { %s725_s24 = smov 128   ;;  %s726_s25 = smov 8  }
  0x28   : > { %547 = dma.hbm_to_vmem [thread:$0]  (!%p811_p12), %s128_s29, 4096, %s130_s3, %s118_s5, %s725_s24, %s725_s24, %s726_s25  }
  0x29   : > { %p835_p1 = pnand %p526_p13, %p159_p0  ;;  %s523_s27 = sshll.u32 %s802_s23, 5 }
  0x2a   : > { %s536_s28 = sshll.u32 %s723_s12, 5  ;;  %s143_s14 = scalar_lea.vmem [#allocation5], %s523_s27 }
  0x2b   : > { %s148_s7 = scalar_lea.hbm %s985_s1, %s536_s28  ;;  %s151_s16 = sshll.u32 %s143_s14, 4  ;;  %s152_s16 = int_to_ptr.vmem [resolvable:$true] %s151_s16 }
  0x2c   : > { %s149_s8 = sshll.u32 %s148_s7, 4  ;;  %s140_s17 = scalar_lea.sflag [#allocation6], %s802_s23  ;;  %s150_s8 = int_to_ptr.hbm [resolvable:$true] %s149_s8 }
  0x2d   : > { %s623_s19 = sshra.s32 %s150_s8, 4  ;;  %s630_s0 = scalar_lea.hbm %s985_s1, 128  ;;  %s624_s19 = int_to_ptr.hbm [resolvable:$true] %s623_s19 }
  0x2e   : > { %s625_s29 = scalar_lea.hbm %s624_s19, 32  ;;  %p631_p4 = scmp.lt.s32.totalorder %s624_s19, %s985_s1 }
  0x2f   : > { %p626_p3 = scmp.ne.s32.totalorder %s624_s19, %s625_s29  ;;  %p632_p5 = scmp.lt.s32.totalorder %s630_s0, %s625_s29 }
  0x31   : > { %p628_p13 = pnand %p626_p3, %p597_p2  ;;  %p633_p7 = por %p632_p5, %p631_p4 }
  0x33   : > { %p629_p0 = pneg %p628_p13 }
  0x35   : > { %p634_p8 = pnand %p633_p7, %p629_p0 }
  0x37   : > { %637 = shalt.err (!%p634_p8)
}
  0x38   : > { %550 = dma.hbm_to_vmem [thread:$0]  (!%p811_p12), %s150_s8, 512, %s152_s16, %s140_s17, %s725_s24, %s725_s24, %s726_s25  }
  0x39   : > { %163 = sbr.rel (%p835_p1) target bundleno = 108 (0x6c), region = 28  ;;  %s859_s23 = sand.u32 (!%p835_p1), 1, %s715_s10  }
  0x3a   : > { %s527_s27 = sshll.u32 (!%p835_p1), %s859_s23, 8  ;;  %s166_s6 = scalar_lea.sflag (!%p835_p1), [#allocation3], %s859_s23 }
  0x3b   : > { %s865_s0 = scalar_lea.vmem (!%p835_p1), [#allocation2], %s527_s27 }
  0x3e   : > { %698 = dma.done.wait (%p787_p6), %s166_s6, 4096  }
  0x3f   : > { %700 = vsyncadd (%p787_p6), %s166_s6, 4294963200  ;;  %s528_s4 = sshll.u32 %s859_s23, 5  ;;  %s176_s24 = scalar_lea.sflag [#allocation6], %s859_s23 }
  0x40   : > { %s873_s25 = scalar_lea.vmem [#allocation5], %s528_s4 }
  0x41   : > { %702 = dma.done.wait (%p787_p6), %s176_s24, 512  }
  0x42   : > { %704 = vsyncadd (%p787_p6), %s176_s24, 4294966784  ;;  %v209_v0 = vld [vmem:[%s865_s0] sm:$0xff]  ;;  %v210_v6 = vld [vmem:[%s865_s0 + $0x8] sm:$0xff]  ;;  %s890_s20 = scalar_lea.vmem [#allocation7], %s527_s27  ;;  %s537_s26 = sshll.u32 %s765_s13, 8 }
  0x43   : > { %v241_v1 = vld [vmem:[%s873_s25] sm:$0xff]  ;;  %v211_v7 = vld [vmem:[%s865_s0 + $0x10] sm:$0xff]  ;;  %v212_v8 = vld [vmem:[%s865_s0 + $0x18] sm:$0xff]  ;;  %s417_s8 = scalar_lea.hbm %s986_s2, %s537_s26  ;;  %s418_s14 = sshll.u32 %s890_s20, 4  ;;  %s419_s14 = int_to_ptr.vmem [resolvable:$true] %s418_s14 }
  0x44   : > { %v277_v2 = vperm.slane %v241_v1, 0  ;;  %v249_v3 = vrot.slane %v241_v1, 1  ;;  %v250_v4 = vrot.slane %v241_v1, 2  ;;  %v251_v5 = vrot.slane %v241_v1, 3  ;;  %v213_v16 = vld [vmem:[%s865_s0 + $0x20] sm:$0xff]  ;;  %v214_v17 = vld [vmem:[%s865_s0 + $0x28] sm:$0xff] }
  0x45   : > { %v252_v9 = vrot.slane %v241_v1, 4  ;;  %v253_v10 = vrot.slane %v241_v1, 5  ;;  %v254_v11 = vrot.slane %v241_v1, 6  ;;  %v215_v20 = vld [vmem:[%s865_s0 + $0x30] sm:$0xff]  ;;  %v255_v22 = vrot.slane %v241_v1, 7  ;;  %v242_v23 = vld [vmem:[%s873_s25 + $0x8] sm:$0xff] }
  0x46   : > { %v341_v12 = vadd.f32 %v277_v2, %v209_v0  ;;  %v278_v13 = vperm.slane %v249_v3, 0  ;;  %v279_v14 = vperm.slane %v250_v4, 0  ;;  %v280_v15 = vperm.slane %v251_v5, 0  ;;  %v216_v27 = vld [vmem:[%s865_s0 + $0x38] sm:$0xff]  ;;  %v217_v33 = vld [vmem:[%s865_s0 + $0x40] sm:$0xff]  ;;  %v218_v38 = vld [vmem:[%s865_s0 + $0x48] sm:$0xff] }
  0x47   : > { %v281_v18 = vperm.slane %v252_v9, 0  ;;  %v282_v19 = vperm.slane %v253_v10, 0  ;;  %v283_v21 = vperm.slane %v254_v11, 0  ;;  %v284_v30 = vperm.slane %v255_v22, 0  ;;  %v219_v39 = vld [vmem:[%s865_s0 + $0x50] sm:$0xff]  ;;  %v220_v45 = vld [vmem:[%s865_s0 + $0x58] sm:$0xff] }
  0x48   : > { %373 = vst [vmem:[%s890_s20] sm:$0xff] %v341_v12  ;;  %v342_v24 = vadd.f32 %v278_v13, %v210_v6  ;;  %v343_v25 = vadd.f32 %v279_v14, %v211_v7  ;;  %v344_v26 = vadd.f32 %v280_v15, %v212_v8  ;;  %v285_v31 = vperm.slane %v242_v23, 0  ;;  %v243_v50 = vld [vmem:[%s873_s25 + $0x10] sm:$0xff]  ;;  %v221_v52 = vld [vmem:[%s865_s0 + $0x60] sm:$0xff]  ;;  %v222_v56 = vld [vmem:[%s865_s0 + $0x68] sm:$0xff]  ;;  %s420_s16 = sshll.u32 %s417_s8, 4  ;;  %s406_s17 = scalar_lea.sflag [#allocation4], %s859_s23  ;;  %s421_s16 = int_to_ptr.hbm [resolvable:$true] %s420_s16 }
  0x49   : > { %v345_v28 = vadd.f32 %v281_v18, %v213_v16  ;;  %v346_v29 = vadd.f32 %v282_v19, %v214_v17  ;;  %v347_v32 = vadd.f32 %v283_v21, %v215_v20  ;;  %v256_v34 = vrot.slane %v242_v23, 1  ;;  %v223_v58 = vld [vmem:[%s865_s0 + $0x70] sm:$0xff]  ;;  %v224_v0 = vld [vmem:[%s865_s0 + $0x78] sm:$0xff]  ;;  %v225_v4 = vld [vmem:[%s865_s0 + $0x80] sm:$0xff]  ;;  %s667_s19 = sshra.s32 %s421_s16, 4  ;;  %s673_s30 = scalar_lea.hbm %s986_s2, 1024  ;;  %s668_s19 = int_to_ptr.hbm [resolvable:$true] %s667_s19 }
  0x4a   : > { %374 = vst [vmem:[%s890_s20 + $0x8] sm:$0xff] %v342_v24  ;;  %v257_v35 = vrot.slane %v242_v23, 2  ;;  %v258_v36 = vrot.slane %v242_v23, 3  ;;  %v348_v37 = vadd.f32 %v284_v30, %v216_v27  ;;  %v259_v40 = vrot.slane %v242_v23, 4  ;;  %v226_v8 = vld [vmem:[%s865_s0 + $0x88] sm:$0xff]  ;;  %v244_v11 = vld [vmem:[%s873_s25 + $0x18] sm:$0xff]  ;;  %p674_p9 = scmp.lt.s32.totalorder %s668_s19, %s986_s2 }
  0x4b   : > { %375 = vst [vmem:[%s890_s20 + $0x10] sm:$0xff] %v343_v25  ;;  %v260_v41 = vrot.slane %v242_v23, 5  ;;  %v261_v42 = vrot.slane %v242_v23, 6  ;;  %v286_v43 = vperm.slane %v256_v34, 0  ;;  %v262_v47 = vrot.slane %v242_v23, 7  ;;  %v227_v13 = vld [vmem:[%s865_s0 + $0x90] sm:$0xff] }
  0x4c   : > { %376 = vst [vmem:[%s890_s20 + $0x18] sm:$0xff] %v344_v26  ;;  %v287_v44 = vperm.slane %v257_v35, 0  ;;  %v288_v46 = vperm.slane %v258_v36, 0  ;;  %v349_v48 = vadd.f32 %v285_v31, %v217_v33  ;;  %v289_v49 = vperm.slane %v259_v40, 0  ;;  %v228_v17 = vld [vmem:[%s865_s0 + $0x98] sm:$0xff]  ;;  %v229_v20 = vld [vmem:[%s865_s0 + $0xa0] sm:$0xff] }
  0x4d   : > { %377 = vst [vmem:[%s890_s20 + $0x20] sm:$0xff] %v345_v28  ;;  %v350_v51 = vadd.f32 %v286_v43, %v218_v38  ;;  %v290_v53 = vperm.slane %v260_v41, 0  ;;  %v291_v57 = vperm.slane %v261_v42, 0  ;;  %v292_v59 = vperm.slane %v262_v47, 0  ;;  %v230_v24 = vld [vmem:[%s865_s0 + $0xa8] sm:$0xff]  ;;  %v231_v28 = vld [vmem:[%s865_s0 + $0xb0] sm:$0xff] }
  0x4e   : > { %378 = vst [vmem:[%s890_s20 + $0x28] sm:$0xff] %v346_v29  ;;  %v351_v54 = vadd.f32 %v287_v44, %v219_v39  ;;  %v352_v55 = vadd.f32 %v288_v46, %v220_v45  ;;  %v263_v60 = vrot.slane %v243_v50, 1  ;;  %v264_v61 = vrot.slane %v243_v50, 2  ;;  %v233_v36 = vld [vmem:[%s865_s0 + $0xc0] sm:$0xff]  ;;  %v234_v40 = vld [vmem:[%s865_s0 + $0xc8] sm:$0xff]  ;;  %v235_v44 = vld [vmem:[%s865_s0 + $0xd0] sm:$0xff] }
  0x4f   : > { %379 = vst [vmem:[%s890_s20 + $0x30] sm:$0xff] %v347_v32  ;;  %v265_v62 = vrot.slane %v243_v50, 3  ;;  %v353_v63 = vadd.f32 %v289_v49, %v221_v52  ;;  %v293_v1 = vperm.slane %v243_v50, 0  ;;  %v266_v2 = vrot.slane %v243_v50, 4  ;;  %v232_v32 = vld [vmem:[%s865_s0 + $0xb8] sm:$0xff]  ;;  %s669_s29 = scalar_lea.hbm %s668_s19, 256 }
  0x50   : > { %380 = vst [vmem:[%s890_s20 + $0x38] sm:$0xff] %v348_v37  ;;  %v354_v3 = vadd.f32 %v290_v53, %v222_v56  ;;  %v294_v5 = vperm.slane %v263_v60, 0  ;;  %v267_v6 = vrot.slane %v243_v50, 5  ;;  %v355_v7 = vadd.f32 %v291_v57, %v223_v58  ;;  %v239_v57 = vld [vmem:[%s865_s0 + $0xf0] sm:$0xff]  ;;  %v240_v60 = vld [vmem:[%s865_s0 + $0xf8] sm:$0xff]  ;;  %p670_p6 = scmp.ne.s32.totalorder %s668_s19, %s669_s29  ;;  %p675_p1 = scmp.lt.s32.totalorder %s673_s30, %s669_s29 }
  0x51   : > { %381 = vst [vmem:[%s890_s20 + $0x40] sm:$0xff] %v349_v48  ;;  %v295_v9 = vperm.slane %v264_v61, 0  ;;  %v268_v10 = vrot.slane %v243_v50, 6  ;;  %v356_v12 = vadd.f32 %v292_v59, %v224_v0  ;;  %v296_v14 = vperm.slane %v265_v62, 0  ;;  %v236_v48 = vld [vmem:[%s865_s0 + $0xd8] sm:$0xff] }
  0x52   : > { %382 = vst [vmem:[%s890_s20 + $0x48] sm:$0xff] %v350_v51  ;;  %v269_v15 = vrot.slane %v243_v50, 7  ;;  %v357_v16 = vadd.f32 %v293_v1, %v225_v4  ;;  %v297_v18 = vperm.slane %v266_v2, 0  ;;  %v358_v19 = vadd.f32 %v294_v5, %v226_v8  ;;  %v237_v51 = vld [vmem:[%s865_s0 + $0xe0] sm:$0xff]  ;;  %p671_p12 = pnand %p670_p6, %p793_p10  ;;  %p676_p3 = por %p675_p1, %p674_p9 }
  0x53   : > { %383 = vst [vmem:[%s890_s20 + $0x50] sm:$0xff] %v351_v54  ;;  %v298_v21 = vperm.slane %v267_v6, 0  ;;  %v270_v22 = vrot.slane %v244_v11, 1  ;;  %v359_v23 = vadd.f32 %v295_v9, %v227_v13  ;;  %v299_v25 = vperm.slane %v268_v10, 0  ;;  %v238_v54 = vld [vmem:[%s865_s0 + $0xe8] sm:$0xff] }
  0x54   : > { %384 = vst [vmem:[%s890_s20 + $0x58] sm:$0xff] %v352_v55  ;;  %v271_v26 = vrot.slane %v244_v11, 2  ;;  %v360_v27 = vadd.f32 %v296_v14, %v228_v17  ;;  %v300_v29 = vperm.slane %v269_v15, 0  ;;  %v272_v30 = vrot.slane %v244_v11, 3  ;;  %p672_p2 = pneg %p671_p12 }
  0x55   : > { %385 = vst [vmem:[%s890_s20 + $0x60] sm:$0xff] %v353_v63  ;;  %v361_v31 = vadd.f32 %v297_v18, %v229_v20  ;;  %v301_v33 = vperm.slane %v244_v11, 0  ;;  %v273_v34 = vrot.slane %v244_v11, 4  ;;  %v362_v35 = vadd.f32 %v298_v21, %v230_v24 }
  0x56   : > { %386 = vst [vmem:[%s890_s20 + $0x68] sm:$0xff] %v354_v3  ;;  %v302_v37 = vperm.slane %v270_v22, 0  ;;  %v274_v38 = vrot.slane %v244_v11, 5  ;;  %v363_v39 = vadd.f32 %v299_v25, %v231_v28  ;;  %v303_v41 = vperm.slane %v271_v26, 0  ;;  %p677_p13 = pnand %p676_p3, %p672_p2 }
  0x57   : > { %387 = vst [vmem:[%s890_s20 + $0x70] sm:$0xff] %v355_v7  ;;  %v275_v42 = vrot.slane %v244_v11, 6  ;;  %v364_v43 = vadd.f32 %v300_v29, %v232_v32  ;;  %v304_v45 = vperm.slane %v272_v30, 0  ;;  %v276_v46 = vrot.slane %v244_v11, 7 }
  0x58   : > { %388 = vst [vmem:[%s890_s20 + $0x78] sm:$0xff] %v356_v12  ;;  %v365_v47 = vadd.f32 %v301_v33, %v233_v36  ;;  %v305_v49 = vperm.slane %v273_v34, 0  ;;  %v366_v50 = vadd.f32 %v302_v37, %v234_v40  ;;  %v306_v52 = vperm.slane %v274_v38, 0 }
  0x59   : > { %389 = vst [vmem:[%s890_s20 + $0x80] sm:$0xff] %v357_v16  ;;  %v367_v53 = vadd.f32 %v303_v41, %v235_v44  ;;  %v307_v55 = vperm.slane %v275_v42, 0  ;;  %v368_v56 = vadd.f32 %v304_v45, %v236_v48  ;;  %v308_v58 = vperm.slane %v276_v46, 0 }
  0x5a   : > { %390 = vst [vmem:[%s890_s20 + $0x88] sm:$0xff] %v358_v19  ;;  %v369_v59 = vadd.f32 %v305_v49, %v237_v51  ;;  %v370_v61 = vadd.f32 %v306_v52, %v238_v54 }
  0x5b   : > { %391 = vst [vmem:[%s890_s20 + $0x90] sm:$0xff] %v359_v23  ;;  %v371_v62 = vadd.f32 %v307_v55, %v239_v57  ;;  %v372_v63 = vadd.f32 %v308_v58, %v240_v60 }
  0x5c   : > { %392 = vst [vmem:[%s890_s20 + $0x98] sm:$0xff] %v360_v27 }
  0x5d   : > { %393 = vst [vmem:[%s890_s20 + $0xa0] sm:$0xff] %v361_v31 }
  0x5e   : > { %394 = vst [vmem:[%s890_s20 + $0xa8] sm:$0xff] %v362_v35 }
  0x5f   : > { %395 = vst [vmem:[%s890_s20 + $0xb0] sm:$0xff] %v363_v39 }
  0x60   : > { %396 = vst [vmem:[%s890_s20 + $0xb8] sm:$0xff] %v364_v43 }
  0x61   : > { %397 = vst [vmem:[%s890_s20 + $0xc0] sm:$0xff] %v365_v47 }
  0x62   : > { %398 = vst [vmem:[%s890_s20 + $0xc8] sm:$0xff] %v366_v50 }
  0x63   : > { %399 = vst [vmem:[%s890_s20 + $0xd0] sm:$0xff] %v367_v53 }
  0x64   : > { %400 = vst [vmem:[%s890_s20 + $0xd8] sm:$0xff] %v368_v56 }
  0x65   : > { %401 = vst [vmem:[%s890_s20 + $0xe0] sm:$0xff] %v369_v59 }
  0x66   : > { %402 = vst [vmem:[%s890_s20 + $0xe8] sm:$0xff] %v370_v61 }
  0x67   : > { %403 = vst [vmem:[%s890_s20 + $0xf0] sm:$0xff] %v371_v62 }
  0x68   : > { %404 = vst [vmem:[%s890_s20 + $0xf8] sm:$0xff] %v372_v63 }
  0x69   : > { %680 = shalt.err (!%p677_p13)
}
  0x6a   : > { %s727_s23 = smov 128   ;;  %s728_s6 = smov 8  }
  0x6b   : > { %542 = dma.vmem_to_hbm [thread:$0]  (%p793_p10), %s419_s14, 4096, %s421_s16, %s406_s17, %s727_s23, %s727_s23, %s728_s6  }
  0x6c PF: > { %p556_p0 = scmp.ge.s32.totalorder %s723_s12, 2  ;;  %s435_s0 = sand.u32 1, %s711_s9  }
  0x6d   : > { %s436_s4 = scalar_lea.sflag [#allocation4], %s435_s0 }
  0x6e   : > { %p552_p4 = pnand %p556_p0, %p797_p11 }
  0x70   : > { %p553_p5 = pneg %p552_p4 }
  0x72   : > { %706 = dma.done.wait (%p553_p5), %s436_s4, 4096  }
  0x73   : > { %708 = vsyncadd (%p553_p5), %s436_s4, 4294963200  ;;  %p18_p7 = scmp.ge.s32.totalorder %s769_s15, 6   ;;  %s995_s9 = smov %s715_s10 }
  0x74   : > { %s996_s10 = smov %s719_s11  ;;  %s997_s11 = smov %s781_s18 }
  0x75   : > { %s998_s12 = smov %s769_s15  ;;  %20 = sbr.rel (!%p18_p7) target bundleno = 9 (0x9), region = 86 }
  0x7a   :  { %442 = vsyncpa [#allocation3], 1 }
  0x7b   :  { %444 = vsyncpa [#allocation3 + $0x1], 1 }
  0x7c   :  { %445 = vsyncpa [#allocation6], 1 }
  0x7d   :  { %447 = vsyncpa [#allocation6 + $0x1], 1 }
  0x7e   :  { %448 = vsyncpa [#allocation4], 1 }
  0x7f   :  { %450 = vsyncpa [#allocation4 + $0x1], 1 }

</bundles_post_ra>
